<compile_context>
chip_gen: v7x
topology: tpu7x:2x2x1
jax: 0.10.0
libtpu: 0.0.40
codegen_flags: <defaults>
</compile_context>

<pallas_src>
import numpy as np
import jax
import jax.numpy as jnp
from jax import lax
from jax.experimental import pallas as pl
from jax.experimental.pallas import tpu as pltpu

_LANE = 128  # TPU lane width; codebook columns padded to a multiple of this.


def _tokenizer_kernel(z_ref, len_ref, et_ref, esq_ref, zq_ref, idx_ref, loss_ref):
    BB, T, C = z_ref.shape
    Vpad = et_ref.shape[1]
    rows = BB * T

    z3 = z_ref[...]                                    # (BB, T, C) f32
    lens = len_ref[...]                                # (BB, 1, 1) int32

    # Prefix padding mask rebuilt in-kernel from per-batch valid lengths.
    t_iota = lax.broadcasted_iota(jnp.int32, (BB, T, 1), 1)
    mask3 = (t_iota < lens).astype(jnp.float32)        # (BB, T, 1)

    # F.normalize(z, dim=-1), torch eps = 1e-12 on the norm:
    #   z * rsqrt(max(sumsq, 1e-24)) == z / max(||z||, 1e-12)   (rsqrt -> EUP)
    sumsq = jnp.sum(z3 * z3, axis=-1, keepdims=True)
    zn3 = z3 * lax.rsqrt(jnp.maximum(sumsq, 1e-24))    # (BB, T, C)

    zn = zn3.reshape(rows, C)                          # flatten batch*time for MXU

    # Pairwise distances; ||zn||^2 is a per-row constant (==1) -> dropped,
    # argmin unaffected. Padded codebook columns carry ||e||^2 = 1e30.
    cross = jnp.dot(zn, et_ref[...], preferred_element_type=jnp.float32)  # (rows, Vpad)
    d = esq_ref[...] - 2.0 * cross

    # First-occurrence argmin over the (padded) codebook axis, like torch.argmin.
    min_d = jnp.min(d, axis=1, keepdims=True)
    col_iota = lax.broadcasted_iota(jnp.int32, d.shape, 1)
    idx = jnp.min(jnp.where(d <= min_d, col_iota, Vpad), axis=1, keepdims=True)

    # One-hot scatter + MXU contraction against e^T (single codebook copy).
    one_hot = (col_iota == idx).astype(jnp.float32)                         # (rows, Vpad)
    quant = lax.dot_general(one_hot, et_ref[...],
                            dimension_numbers=(((1,), (1,)), ((), ())),
                            preferred_element_type=jnp.float32)             # (rows, C)

    # Straight-through forward value == quantized; mask padded timesteps.
    # TODO(synk): forward semantics only; wrap in custom_vjp if this path is
    # ever differentiated (straight-through gradient not implemented here).
    zq3 = quant.reshape(BB, T, C) * mask3
    zq_ref[...] = zq3

    # Lane-dense (1, 1, BB*T) index output via an exact iota.one_hot contraction
    # (exactly one 1 per row, index values < 2**24 -> exact in f32).
    iota_v = lax.broadcasted_iota(jnp.int32, (1, Vpad), 1).astype(jnp.float32)
    idx_lane = lax.dot_general(iota_v, one_hot,
                               dimension_numbers=(((1,), (1,)), ((), ())),
                               preferred_element_type=jnp.float32)           # (1, rows)
    idx_ref[...] = idx_lane.astype(jnp.int32).reshape(1, 1, rows)

    # ---- fused per-block loss numerators (normalized in the wrapper) -------
    # lane 0: commitment  = sum((zn - zq)^2 * mask)
    commit = jnp.sum((zn3 - zq3) * (zn3 - zq3) * mask3)

    # lane 1: smoothness  = sum_t (zn[t] - zn[t+1])^2 * mask[t+1]
    # Neighbour row fetched with an XLU rotate instead of off-by-one sublane
    # slices. The pair mask is derived from the rotated time-iota, so it is
    # independent of the rotate direction and zeroes the wrapped row.
    shift = (T - 1) % T
    zn_nb = pltpu.roll(zn3, shift=shift, axis=1)       # neighbour timestep
    ti_nb = pltpu.roll(t_iota, shift=shift, axis=1)
    pair_ok = (jnp.abs(ti_nb - t_iota) == 1) & (jnp.maximum(ti_nb, t_iota) < lens)
    pmask = pair_ok.astype(jnp.float32)
    sdiff = zn3 - zn_nb
    smooth = jnp.sum(sdiff * sdiff * pmask)
    if T == 2:          # roll-by-1 on a length-2 axis counts the single pair twice
        smooth = smooth * 0.5

    lane2 = lax.broadcasted_iota(jnp.int32, (1, 1, 2), 2)
    loss_ref[...] = jnp.where(lane2 == 0, commit, smooth)


def _block_bytes_estimate(bb, T, C, Vpad):
    rows = bb * T
    io = 4 * rows * C * 4            # z in + zq out, double-buffered
    tmp = 4 * rows * Vpad * 4        # cross / d / select / one_hot temporaries
    code = 2 * (C + 1) * Vpad * 4    # e^T + ||e||^2 (double-buffered)
    return io + tmp + code


def _choose_block_b(B, T, C, Vpad, budget_bytes=24 << 20):
    """Largest divisor of B whose per-step working set fits the VMEM budget.

    Note (v7x): an even number of grid steps keeps both TensorCores busy; at
    tiny shapes (single step) this does not matter.
    """
    best = 1
    for bb in range(1, B + 1):
        if B % bb == 0 and bb * T <= 8192 and _block_bytes_estimate(bb, T, C, Vpad) <= budget_bytes:
            best = bb
    return best


def tokenizer_quantize(z, codebook_weight, mask, block_b=None):
    """z: (B,T,C), codebook_weight: (V+1, C), mask: (B,T,1) prefix/padding mask."""
    B, T, C = z.shape
    z = z.astype(jnp.float32)
    mask = mask.astype(jnp.float32)

    # Hoisted codebook prep: drop row 0 (like the torch module), pad the vocab
    # axis to a lane multiple, and keep only the transposed copy + col norms.
    e = codebook_weight[1:, :].astype(jnp.float32)          # (V, C)
    V = e.shape[0]
    Vpad = ((V + _LANE - 1) // _LANE) * _LANE
    e_t = jnp.zeros((C, Vpad), jnp.float32).at[:, :V].set(jnp.transpose(e))
    e_sq = jnp.full((1, Vpad), 1e30, jnp.float32).at[0, :V].set(jnp.sum(e * e, axis=1))

    # Per-batch valid lengths. TODO(synk): assumes a prefix mask (as the torch
    # dedup code does); arbitrary masks would need the full (B,T,1) mask input.
    lengths = jnp.sum(mask, axis=(1, 2)).astype(jnp.int32)  # (B,)
    lens_in = lengths.reshape(B, 1, 1)

    BB = block_b if block_b is not None else _choose_block_b(B, T, C, Vpad)
    assert B % BB == 0, "block_b must divide the batch size"
    nblk = B // BB
    rows = BB * T

    # VMEM limit derived from the chosen block; cap keeps v7x (64 MiB) safe.
    vmem_limit = int(min(48 << 20, max(16 << 20, 2 * _block_bytes_estimate(BB, T, C, Vpad))))

    zq, idx, loss_p = pl.pallas_call(
        _tokenizer_kernel,
        out_shape=(
            jax.ShapeDtypeStruct((B, T, C), jnp.float32),      # masked z_q
            jax.ShapeDtypeStruct((nblk, 1, rows), jnp.int32),  # lane-dense indices
            jax.ShapeDtypeStruct((nblk, 1, 2), jnp.float32),   # [commit, smooth] partials
        ),
        grid_spec=pltpu.PrefetchScalarGridSpec(
            num_scalar_prefetch=0,
            grid=(nblk,),
            in_specs=[
                pl.BlockSpec((BB, T, C), lambda b: (b, 0, 0)),   # z
                pl.BlockSpec((BB, 1, 1), lambda b: (b, 0, 0)),   # lengths
                pl.BlockSpec((C, Vpad), lambda b: (0, 0)),       # e^T  (fetched once)
                pl.BlockSpec((1, Vpad), lambda b: (0, 0)),       # ||e||^2
            ],
            out_specs=(
                pl.BlockSpec((BB, T, C), lambda b: (b, 0, 0)),
                pl.BlockSpec((1, 1, rows), lambda b: (b, 0, 0)),
                pl.BlockSpec((1, 1, 2), lambda b: (b, 0, 0)),
            ),
        ),
        compiler_params=pltpu.CompilerParams(
            dimension_semantics=("parallel",),    # megacore sharding on v7x
            vmem_limit_bytes=vmem_limit,
        ),
    )(z, lens_in, e_t, e_sq)

    # Guard against a fully-masked batch (torch would produce nan here).
    valid_count = jnp.maximum(jnp.sum(lengths).astype(jnp.float32) * C, 1.0)
    commitment_loss = jnp.sum(loss_p[:, 0, 0]) / valid_count
    smoothness_loss = jnp.sum(loss_p[:, 0, 1]) / valid_count
    encodings = idx.reshape(B, T)
    return zq, encodings, commitment_loss, smoothness_loss


def _reference_quantize(z, codebook_weight, mask):
    """Pure-JAX reference mirroring the torch forward (for validation)."""
    z = jnp.asarray(z, jnp.float32)
    mask = jnp.asarray(mask, jnp.float32)
    B, T, C = z.shape
    zn = z / jnp.maximum(jnp.linalg.norm(z, axis=-1, keepdims=True), 1e-12)
    e = jnp.asarray(codebook_weight, jnp.float32)[1:]
    zf = zn.reshape(-1, C)
    d = jnp.sum(zf ** 2, 1, keepdims=True) - 2.0 * zf @ e.T + jnp.sum(e ** 2, 1)[None, :]
    idx = jnp.argmin(d, axis=1)
    zq = e[idx].reshape(B, T, C) * mask
    vc = jnp.maximum(jnp.sum(mask) * C, 1.0)
    commit = jnp.sum((zn - zq) ** 2 * mask) / vc
    smooth = jnp.sum((zn[:, :-1] - zn[:, 1:]) ** 2 * mask[:, 1:]) / vc
    return zq, idx.reshape(B, T), commit, smooth


def remove_consecutive_repeated_indices(encodings, mask, z_q, skip_non_speech=False):
    # TODO(synk): ragged, data-dependent dedup has no clean Pallas equivalent;
    # kept as host-side numpy glue mirroring the torch loop exactly.
    enc = np.asarray(encodings)
    msk = np.asarray(mask)[..., 0]      # (B, T)
    zq = np.asarray(z_q)
    B, T, C = zq.shape
    selected_encodings_list, selected_encodings_repeated_list = [], []
    n_z_qs, max_len = [], 0
    masks_tensor = np.zeros((B, T), dtype=np.float32)
    for b in range(B):
        valid_len = int(msk[b].sum())
        ind = enc[b, :valid_len]
        zqb = zq[b, :valid_len]
        selected, selected_rep, segs = [], [], []
        i = 0
        while i < valid_len:
            v = int(ind[i])
            j = i
            while j < valid_len and int(ind[j]) == v:
                j += 1
            selected_rep.extend([v + 1] * (j - i))
            if not (v == 28 and skip_non_speech):
                selected.append(v + 1)
                segs.append(zqb[i:i + 1])          # first timestep of the segment
            i = j
        selected_encodings_list.append(selected)
        selected_encodings_repeated_list.append(selected_rep)
        n_z_qs.append(np.concatenate(segs, axis=0) if segs
                      else np.zeros((1, C), dtype=zq.dtype))
        L = len(selected)
        masks_tensor[b, :L] = 1.0
        max_len = max(max_len, L)
    pad_T = max(max(a.shape[0] for a in n_z_qs), 1)
    padded = np.zeros((B, pad_T, C), dtype=zq.dtype)
    for b, a in enumerate(n_z_qs):
        padded[b, :a.shape[0]] = a
    masks = masks_tensor[:, :max_len][..., None]
    padded = padded * masks
    return padded, padded.copy(), masks, selected_encodings_list, selected_encodings_repeated_list


def tokenizer_forward(z, codebook_weight, mask, skip_non_speech=False):
    zq, encodings, commitment_loss, smoothness_loss = tokenizer_quantize(
        z, codebook_weight, mask)
    (n_student_probs, n_z_q, n_mask, sel_list, sel_rep_list) = \
        remove_consecutive_repeated_indices(encodings, mask, zq, skip_non_speech)
    return (n_student_probs, smoothness_loss, commitment_loss, zq, n_z_q,
            n_mask, sel_list, sel_rep_list)


if __name__ == "__main__":
    B, T, C = 2, 8, 32
    VOCAB = 33            # codebook rows; row 0 is dropped inside, like torch

    key = jax.random.PRNGKey(0)
    k1, k2 = jax.random.split(key)
    z = jax.random.normal(k1, (B, T, C), dtype=jnp.float32)
    codebook_weight = jax.random.normal(k2, (VOCAB, C), dtype=jnp.float32)

    lengths = jnp.array([8, 5], dtype=jnp.int32)
    mask = (jnp.arange(T)[None, :] < lengths[:, None]).astype(jnp.float32)[..., None]

    outs = tokenizer_forward(z, codebook_weight, mask)
    (n_student_probs, smoothness_loss, commitment_loss, z_q, n_z_q,
     n_mask, sel_list, sel_rep_list) = outs

    jax.block_until_ready(z_q)
    jax.block_until_ready(commitment_loss)
    jax.block_until_ready(smoothness_loss)

    # Validate the kernel against a pure-JAX reference of the torch forward.
    zq_k, enc_k, commit_k, smooth_k = tokenizer_quantize(z, codebook_weight, mask)
    zq_r, enc_r, commit_r, smooth_r = _reference_quantize(z, codebook_weight, mask)
    np.testing.assert_array_equal(np.asarray(enc_k), np.asarray(enc_r))
    np.testing.assert_allclose(np.asarray(zq_k), np.asarray(zq_r), rtol=2e-3, atol=2e-3)
    np.testing.assert_allclose(float(commit_k), float(commit_r), rtol=2e-3, atol=2e-3)
    np.testing.assert_allclose(float(smooth_k), float(smooth_r), rtol=2e-3, atol=2e-3)

    assert z_q.shape == (B, T, C)
    assert n_z_q.shape[0] == B and n_z_q.shape[2] == C
    assert bool(jnp.isfinite(commitment_loss)) and bool(jnp.isfinite(smoothness_loss))
    print("KERNEL_OK")
</pallas_src>

<mosaic_0001>
module attributes {stable_mosaic.version = 11 : i64} {
  func.func @_tokenizer_kernel(%arg0: i32, %arg1: memref<2x8x32xf32, #tpu.memory_space<vmem>>, %arg2: memref<2x1x1xi32, #tpu.memory_space<vmem>>, %arg3: memref<32x128xf32, #tpu.memory_space<vmem>>, %arg4: memref<1x128xf32, #tpu.memory_space<vmem>>, %arg5: memref<2x8x32xf32, #tpu.memory_space<vmem>>, %arg6: memref<1x1x16xi32, #tpu.memory_space<vmem>>, %arg7: memref<1x1x2xf32, #tpu.memory_space<vmem>>) attributes {dimension_semantics = [#tpu.dimension_semantics<parallel>], iteration_bounds = array<i64: 1>, scalar_prefetch = 0 : i64, scratch_operands = 0 : i64, tpu.core_type = #tpu.core_type<tc>, window_params = [{transform_indices = @transform_0, window_bounds = array<i64: 2, 8, 32>}, {transform_indices = @transform_1, window_bounds = array<i64: 2, 1, 1>}, {pipeline_mode = #tpu.pipeline_mode<synchronous>, transform_indices = @transform_2, window_bounds = array<i64: 32, 128>}, {pipeline_mode = #tpu.pipeline_mode<synchronous>, transform_indices = @transform_3, window_bounds = array<i64: 1, 128>}, {transform_indices = @transform_4, window_bounds = array<i64: 2, 8, 32>}, {transform_indices = @transform_5, window_bounds = array<i64: 1, 1, 16>}, {transform_indices = @transform_6, window_bounds = array<i64: 1, 1, 2>}]} {
    %c0 = arith.constant 0 : index
    %c0_0 = arith.constant 0 : index
    %c0_1 = arith.constant 0 : index
    %0 = vector.load %arg1[%c0, %c0_0, %c0_1] : memref<2x8x32xf32, #tpu.memory_space<vmem>>, vector<2x8x32xf32>
    %c0_2 = arith.constant 0 : index
    %c0_3 = arith.constant 0 : index
    %c0_4 = arith.constant 0 : index
    %1 = vector.load %arg2[%c0_2, %c0_3, %c0_4] : memref<2x1x1xi32, #tpu.memory_space<vmem>>, vector<2x1x1xi32>
    %2 = tpu.iota {dimensions = array<i32: 1>} : vector<2x8x1xi32>
    %3 = vector.broadcast %1 : vector<2x1x1xi32> to vector<2x8x1xi32>
    %4 = arith.cmpi slt, %2, %3 : vector<2x8x1xi32>
    %5 = arith.extui %4 : vector<2x8x1xi1> to vector<2x8x1xi32>
    %6 = arith.sitofp %5 : vector<2x8x1xi32> to vector<2x8x1xf32>
    %7 = arith.mulf %0, %0 : vector<2x8x32xf32>
    %cst = arith.constant dense<0.000000e+00> : vector<2x8xf32>
    %8 = vector.multi_reduction <add>, %7, %cst [2] : vector<2x8x32xf32> to vector<2x8xf32>
    %9 = vector.shape_cast %8 : vector<2x8xf32> to vector<2x8x1xf32>
    %cst_5 = arith.constant 1.000000e-24 : f32
    %10 = vector.broadcast %cst_5 : f32 to vector<2x8x1xf32>
    %11 = arith.maximumf %9, %10 : vector<2x8x1xf32>
    %12 = math.rsqrt %11 : vector<2x8x1xf32>
    %13 = vector.broadcast %12 : vector<2x8x1xf32> to vector<2x8x32xf32>
    %14 = arith.mulf %0, %13 : vector<2x8x32xf32>
    %15 = vector.shape_cast %14 : vector<2x8x32xf32> to vector<16x32xf32>
    %c0_6 = arith.constant 0 : index
    %c0_7 = arith.constant 0 : index
    %16 = vector.load %arg3[%c0_6, %c0_7] : memref<32x128xf32, #tpu.memory_space<vmem>>, vector<32x128xf32>
    %cst_8 = arith.constant dense<0.000000e+00> : vector<16x128xf32>
    %17 = tpu.matmul %15, %16, %cst_8 {dimension_numbers = #tpu.dot_dimension_numbers<[1], [0], [0], [1], [0, 0, 1, 1], [], []>} : vector<16x32xf32>, vector<32x128xf32>, vector<16x128xf32> -> vector<16x128xf32>
    %c0_9 = arith.constant 0 : index
    %c0_10 = arith.constant 0 : index
    %18 = vector.load %arg4[%c0_9, %c0_10] : memref<1x128xf32, #tpu.memory_space<vmem>>, vector<1x128xf32>
    %cst_11 = arith.constant 2.000000e+00 : f32
    %19 = vector.broadcast %cst_11 : f32 to vector<16x128xf32>
    %20 = arith.mulf %19, %17 : vector<16x128xf32>
    %21 = vector.broadcast %18 : vector<1x128xf32> to vector<16x128xf32>
    %22 = arith.subf %21, %20 : vector<16x128xf32>
    %cst_12 = arith.constant dense<0x7F800000> : vector<16xf32>
    %23 = vector.multi_reduction <minimumf>, %22, %cst_12 [1] : vector<16x128xf32> to vector<16xf32>
    %24 = vector.shape_cast %23 : vector<16xf32> to vector<16x1xf32>
    %25 = tpu.iota {dimensions = array<i32: 1>} : vector<16x128xi32>
    %26 = vector.broadcast %24 : vector<16x1xf32> to vector<16x128xf32>
    %27 = arith.cmpf ole, %22, %26 : vector<16x128xf32>
    %c128_i32 = arith.constant 128 : i32
    %28 = vector.broadcast %c128_i32 : i32 to vector<16x128xi32>
    %29 = arith.select %27, %25, %28 : vector<16x128xi1>, vector<16x128xi32>
    %cst_13 = arith.constant dense<2147483647> : vector<16xi32>
    %30 = vector.multi_reduction <minsi>, %29, %cst_13 [1] : vector<16x128xi32> to vector<16xi32>
    %31 = vector.shape_cast %30 : vector<16xi32> to vector<16x1xi32>
    %32 = vector.broadcast %31 : vector<16x1xi32> to vector<16x128xi32>
    %33 = arith.cmpi eq, %25, %32 : vector<16x128xi32>
    %34 = arith.extui %33 : vector<16x128xi1> to vector<16x128xi32>
    %35 = arith.sitofp %34 : vector<16x128xi32> to vector<16x128xf32>
    %c0_14 = arith.constant 0 : index
    %c0_15 = arith.constant 0 : index
    %36 = vector.load %arg3[%c0_14, %c0_15] : memref<32x128xf32, #tpu.memory_space<vmem>>, vector<32x128xf32>
    %cst_16 = arith.constant dense<0.000000e+00> : vector<16x32xf32>
    %37 = tpu.matmul %35, %36, %cst_16 {dimension_numbers = #tpu.dot_dimension_numbers<[1], [1], [0], [0], [0, 0, 1, 0], [], []>} : vector<16x128xf32>, vector<32x128xf32>, vector<16x32xf32> -> vector<16x32xf32>
    %38 = vector.shape_cast %37 : vector<16x32xf32> to vector<2x8x32xf32>
    %39 = vector.broadcast %6 : vector<2x8x1xf32> to vector<2x8x32xf32>
    %40 = arith.mulf %38, %39 : vector<2x8x32xf32>
    %c0_17 = arith.constant 0 : index
    %c0_18 = arith.constant 0 : index
    %c0_19 = arith.constant 0 : index
    %41 = vector.load %arg5[%c0_17, %c0_18, %c0_19] : memref<2x8x32xf32, #tpu.memory_space<vmem>>, vector<2x8x32xf32>
    tpu.vector_store %arg5[%c0_17, %c0_18, %c0_19], %40 {strides = array<i32>} : memref<2x8x32xf32, #tpu.memory_space<vmem>>, vector<2x8x32xf32>,
    %42 = tpu.iota {dimensions = array<i32: 1>} : vector<1x128xi32>
    %43 = arith.sitofp %42 : vector<1x128xi32> to vector<1x128xf32>
    %cst_20 = arith.constant dense<0.000000e+00> : vector<1x16xf32>
    %44 = tpu.matmul %43, %35, %cst_20 {dimension_numbers = #tpu.dot_dimension_numbers<[1], [1], [0], [0], [0, 0, 1, 0], [], []>} : vector<1x128xf32>, vector<16x128xf32>, vector<1x16xf32> -> vector<1x16xf32>
    %45 = arith.fptosi %44 : vector<1x16xf32> to vector<1x16xi32>
    %46 = vector.shape_cast %45 : vector<1x16xi32> to vector<1x1x16xi32>
    %c0_21 = arith.constant 0 : index
    %c0_22 = arith.constant 0 : index
    %c0_23 = arith.constant 0 : index
    %47 = vector.load %arg6[%c0_21, %c0_22, %c0_23] : memref<1x1x16xi32, #tpu.memory_space<vmem>>, vector<1x1x16xi32>
    tpu.vector_store %arg6[%c0_21, %c0_22, %c0_23], %46 {strides = array<i32>} : memref<1x1x16xi32, #tpu.memory_space<vmem>>, vector<1x1x16xi32>,
    %48 = arith.subf %14, %40 : vector<2x8x32xf32>
    %49 = arith.subf %14, %40 : vector<2x8x32xf32>
    %50 = arith.mulf %48, %49 : vector<2x8x32xf32>
    %51 = vector.broadcast %6 : vector<2x8x1xf32> to vector<2x8x32xf32>
    %52 = arith.mulf %50, %51 : vector<2x8x32xf32>
    %53 = vector.shape_cast %52 : vector<2x8x32xf32> to vector<1x2x8x32xf32>
    %cst_24 = arith.constant dense<0.000000e+00> : vector<1xf32>
    %54 = vector.multi_reduction <add>, %53, %cst_24 [1, 2, 3] : vector<1x2x8x32xf32> to vector<1xf32>
    %55 = vector.shape_cast %54 : vector<1xf32> to vector<1x1x1x1xf32>
    %56 = vector.extract %55[0, 0, 0, 0] : f32 from vector<1x1x1x1xf32>
    %c7_i32 = arith.constant 7 : i32
    %57 = tpu.dynamic_rotate %14 by %c7_i32 dim 1 : vector<2x8x32xf32>, i32 -> vector<2x8x32xf32>
    %c7_i32_25 = arith.constant 7 : i32
    %58 = tpu.dynamic_rotate %2 by %c7_i32_25 dim 1 : vector<2x8x1xi32>, i32 -> vector<2x8x1xi32>
    %59 = arith.subi %58, %2 : vector<2x8x1xi32>
    %60 = math.absi %59 : vector<2x8x1xi32>
    %c1_i32 = arith.constant 1 : i32
    %61 = vector.broadcast %c1_i32 : i32 to vector<2x8x1xi32>
    %62 = arith.cmpi eq, %60, %61 : vector<2x8x1xi32>
    %63 = arith.maxsi %58, %2 : vector<2x8x1xi32>
    %64 = vector.broadcast %1 : vector<2x1x1xi32> to vector<2x8x1xi32>
    %65 = arith.cmpi slt, %63, %64 : vector<2x8x1xi32>
    %66 = arith.andi %62, %65 : vector<2x8x1xi1>
    %67 = arith.extui %66 : vector<2x8x1xi1> to vector<2x8x1xi32>
    %68 = arith.sitofp %67 : vector<2x8x1xi32> to vector<2x8x1xf32>
    %69 = arith.subf %14, %57 : vector<2x8x32xf32>
    %70 = arith.mulf %69, %69 : vector<2x8x32xf32>
    %71 = vector.broadcast %68 : vector<2x8x1xf32> to vector<2x8x32xf32>
    %72 = arith.mulf %70, %71 : vector<2x8x32xf32>
    %73 = vector.shape_cast %72 : vector<2x8x32xf32> to vector<1x2x8x32xf32>
    %cst_26 = arith.constant dense<0.000000e+00> : vector<1xf32>
    %74 = vector.multi_reduction <add>, %73, %cst_26 [1, 2, 3] : vector<1x2x8x32xf32> to vector<1xf32>
    %75 = vector.shape_cast %74 : vector<1xf32> to vector<1x1x1x1xf32>
    %76 = vector.extract %75[0, 0, 0, 0] : f32 from vector<1x1x1x1xf32>
    %77 = tpu.iota {dimensions = array<i32: 2>} : vector<1x1x2xi32>
    %c0_i32 = arith.constant 0 : i32
    %78 = vector.broadcast %c0_i32 : i32 to vector<1x1x2xi32>
    %79 = arith.cmpi eq, %77, %78 : vector<1x1x2xi32>
    %80 = vector.broadcast %56 : f32 to vector<1x1x2xf32>
    %81 = vector.broadcast %76 : f32 to vector<1x1x2xf32>
    %82 = arith.select %79, %80, %81 : vector<1x1x2xi1>, vector<1x1x2xf32>
    %c0_27 = arith.constant 0 : index
    %c0_28 = arith.constant 0 : index
    %c0_29 = arith.constant 0 : index
    %83 = vector.load %arg7[%c0_27, %c0_28, %c0_29] : memref<1x1x2xf32, #tpu.memory_space<vmem>>, vector<1x1x2xf32>
    tpu.vector_store %arg7[%c0_27, %c0_28, %c0_29], %82 {strides = array<i32>} : memref<1x1x2xf32, #tpu.memory_space<vmem>>, vector<1x1x2xf32>,
    return
  }
  func.func @transform_0(%arg0: i32) -> (i32, i32, i32) {
    %c0_i32 = arith.constant 0 : i32
    %c0_i32_0 = arith.constant 0 : i32
    %c0_i32_1 = arith.constant 0 : i32
    return %arg0, %c0_i32, %c0_i32_0 : i32, i32, i32
  }
  func.func @transform_1(%arg0: i32) -> (i32, i32, i32) {
    %c0_i32 = arith.constant 0 : i32
    %c0_i32_0 = arith.constant 0 : i32
    %c0_i32_1 = arith.constant 0 : i32
    return %arg0, %c0_i32, %c0_i32_0 : i32, i32, i32
  }
  func.func @transform_2(%arg0: i32) -> (i32, i32) {
    %c0_i32 = arith.constant 0 : i32
    %c0_i32_0 = arith.constant 0 : i32
    %c0_i32_1 = arith.constant 0 : i32
    return %c0_i32, %c0_i32_0 : i32, i32
  }
  func.func @transform_3(%arg0: i32) -> (i32, i32) {
    %c0_i32 = arith.constant 0 : i32
    %c0_i32_0 = arith.constant 0 : i32
    %c0_i32_1 = arith.constant 0 : i32
    return %c0_i32, %c0_i32_0 : i32, i32
  }
  func.func @transform_4(%arg0: i32) -> (i32, i32, i32) {
    %c0_i32 = arith.constant 0 : i32
    %c0_i32_0 = arith.constant 0 : i32
    %c0_i32_1 = arith.constant 0 : i32
    return %arg0, %c0_i32, %c0_i32_0 : i32, i32, i32
  }
  func.func @transform_5(%arg0: i32) -> (i32, i32, i32) {
    %c0_i32 = arith.constant 0 : i32
    %c0_i32_0 = arith.constant 0 : i32
    %c0_i32_1 = arith.constant 0 : i32
    return %arg0, %c0_i32, %c0_i32_0 : i32, i32, i32
  }
  func.func @transform_6(%arg0: i32) -> (i32, i32, i32) {
    %c0_i32 = arith.constant 0 : i32
    %c0_i32_0 = arith.constant 0 : i32
    %c0_i32_1 = arith.constant 0 : i32
    return %arg0, %c0_i32, %c0_i32_0 : i32, i32, i32
  }
}

</mosaic_0001>

<bundles_post_ra>
// kernel: tpu_custom_call.1
= control target key start
LH: loop header
LB: loop body
LE: loop exit
PB: predicated region body
PF: predicated region fallthrough
CT: control target
= control target key end

     0   :  { %12 = vsyncpa [#allocation3], 0  ;;  %s891_s0 = inlined_call_operand.hbm [shape: f32[2,8,32], index: 0, kind: input, shape index: {}]   ;;  %s892_s1 = inlined_call_operand.vmem [shape: s32[2,1,1], index: 1, kind: input, shape index: {}]   ;;  %s893_s2 = inlined_call_operand.hbm [shape: f32[32,128], index: 2, kind: input, shape index: {}]   ;;  %s894_s3 = inlined_call_operand.vmem [shape: f32[1,128], index: 3, kind: input, shape index: {}]   ;;  %s895_s4 = inlined_call_operand.hbm [shape: f32[2,8,32], index: 4, kind: output, shape index: {0}]   ;;  %s896_s5 = inlined_call_operand.hbm [shape: s32[1,1,16], index: 5, kind: output, shape index: {1}]   ;;  %s897_s6 = inlined_call_operand.hbm [shape: f32[1,1,2], index: 6, kind: output, shape index: {2}]  }
   0x1   :  { %13 = vsyncpa [#allocation6], 0 }
   0x2   :  { %14 = vsyncpa [#allocation4], 0 }
   0x3   :  { %15 = vsyncpa [#allocation9], 0  ;;  %s735_s21 = smov [#allocation2]   ;;  %s617_s25 = scalar_lea.hbm %s891_s0, 256 }
   0x4   :  { %s21_s22 = sshll.u32 %s735_s21, 4  ;;  %p618_p0 = scmp.ne.s32.totalorder %s891_s0, %s617_s25  ;;  %s22_s22 = int_to_ptr.vmem [resolvable:$true] %s21_s22 }
   0x5   :  { %p621_p1 = scmp.lt.u32.totalorder %s617_s25, %s891_s0 }
   0x7   :  { %p623_p2 = pnand %p621_p1, %p618_p0 }
   0x9   :  { %626 = shalt.err (!%p623_p2)
}
   0xa   :  { %s627_s30 = scalar_lea.vmem %s22_s22, 256  ;;  %p632_p4 = scmp.lt.s32.totalorder %s22_s22, %s22_s22 }
   0xb   :  { %p628_p3 = scmp.ne.s32.totalorder %s22_s22, %s627_s30  ;;  %p633_p5 = scmp.lt.s32.totalorder %s627_s30, %s627_s30 }
   0xd   :  { %p634_p6 = por %p633_p5, %p632_p4 }
   0xf   :  { %p635_p7 = pnand %p634_p6, %p628_p3 }
  0x11   :  { %638 = shalt.err (!%p635_p7)
}
  0x12   :  { %s736_s7 = smov 128   ;;  %s737_s8 = smov 8  }
  0x13   :  { %27 = dma.hbm_to_vmem [thread:$0]  %s891_s0, 256, %s22_s22, [#allocation3], %s736_s7, %s736_s7, %s737_s8  }
  0x14   :  { %s738_s11 = smov [#allocation5]   ;;  %s639_s15 = scalar_lea.hbm %s893_s2, 512 }
  0x15   :  { %s35_s12 = sshll.u32 %s738_s11, 4  ;;  %p640_p8 = scmp.ne.s32.totalorder %s893_s2, %s639_s15  ;;  %s36_s12 = int_to_ptr.vmem [resolvable:$true] %s35_s12 }
  0x16   :  { %p643_p9 = scmp.lt.u32.totalorder %s639_s15, %s893_s2 }
  0x18   :  { %p645_p10 = pnand %p643_p9, %p640_p8 }
  0x1a   :  { %648 = shalt.err (!%p645_p10)
}
  0x1b   :  { %s649_s20 = scalar_lea.vmem %s36_s12, 512  ;;  %p654_p12 = scmp.lt.s32.totalorder %s36_s12, %s36_s12 }
  0x1c   :  { %p650_p11 = scmp.ne.s32.totalorder %s36_s12, %s649_s20  ;;  %p655_p13 = scmp.lt.s32.totalorder %s649_s20, %s649_s20 }
  0x1e   :  { %p656_p0 = por %p655_p13, %p654_p12 }
  0x20   :  { %p657_p1 = pnand %p656_p0, %p650_p11 }
  0x22   :  { %660 = shalt.err (!%p657_p1)
}
  0x23   :  { %41 = dma.hbm_to_vmem [thread:$0]  %s893_s2, 512, %s36_s12, [#allocation6], %s736_s7, %s736_s7, %s737_s8  }
  0x24   :  { %727 = dma.done.wait [#allocation3], 256  }
  0x25   :  { %728 = vsyncadd [#allocation3], 4294967040 }
  0x26   :  { %729 = dma.done.wait [#allocation6], 512  }
  0x27   :  { %730 = vsyncadd [#allocation6], 4294966784  ;;  %v50_v0 = vld [vmem:[#allocation2] sm:$0xff]  ;;  %vm72_vm0 = vcmask 261120   ;;  %v51_v1 = vld [vmem:[#allocation2 + $0x8] sm:$0xff]  ;;  %v54_v27 = vlaneseq  ;;  %v739_v37 = vmov 0  }
  0x28   :  { %v70_v2 = vmul.f32 %v50_v0, %v50_v0  ;;  %v71_v3 = vmul.f32 %v51_v1, %v51_v1  ;;  %v85_v6 = vld [vmem:[#allocation5] sm:$0xff]  ;;  %v86_v7 = vld [vmem:[#allocation5 + $0x8] sm:$0xff]  ;;  %v87_v8 = vld [vmem:[#allocation5 + $0x10] sm:$0xff]  ;;  %607 = vset.pattern.permute.xlu1 %v739_v37  ;;  %601 = vset.pattern.permute.xlu0 %v739_v37  ;;  %v740_v54 = vmov 0.0   ;;  %v741_v61 = vmov 0.0|0.0   ;;  %s746_s27 = smov [#allocation7]  }
  0x29   :  { %v563_v9 = vpack.c.bf16 %v86_v7, %v85_v6  ;;  %v88_v10 = vld [vmem:[#allocation5 + $0x18] sm:$0xff]  ;;  %v509_v22 = vld [vmem:[%s894_s3] ss:$0 sm:$0xff]  ;;  %v826_v28 = vand.u32 127, %v54_v27  ;;  %v55_v38 = vshrl.u32 %v54_v27, 7  ;;  %s463_s28 = sshll.u32 %s746_s27, 4  ;;  %s464_s28 = int_to_ptr.vmem [resolvable:$true] %s463_s28 }
  0x2a   :  { %v73_v4 = vsel %vm72_vm0, %v70_v2, 0.0  ;;  %v76_v5 = vsel %vm72_vm0, %v71_v3, 0.0  ;;  %v567_v11 = vpack.c.bf16 %v88_v10, %v87_v8  ;;  %v503_v51 = vld [vmem:[%s892_s1] ss:$0 sm:$0xff]  ;;  %v504_v53 = vld [vmem:[%s892_s1 + $0x1] ss:$0 sm:$0xff] }
  0x2b   :  { %74 = vadd.xlane.f32.xlu0 %v73_v4  ;;  %564 = vmatprep.subr.bf16.mxu0 %v563_v9  ;;  %v408_v39 = vrot.slane %v55_v38, 1  ;;  %vm64_vm11 = vcmp.lt.s32.totalorder %v55_v38, %v503_v51  ;;  %vm65_vm12 = vcmp.lt.s32.totalorder %v55_v38, %v504_v53  ;;  %s745_s1 = smov [#allocation8]  }
  0x2c   :  { %572 = vmatprep.subr.bf16.mxu1 %v563_v9  ;;  %566 = vmatpush3.bf16.msra.mxu0 %v563_v9  ;;  %v505_v57 = vsel %vm64_vm11, 1.0, %v740_v54  ;;  %v506_v58 = vsel %vm65_vm12, 1.0, %v740_v54  ;;  %s476_s26 = sshll.u32 %s745_s1, 4  ;;  %s477_s26 = int_to_ptr.vmem [resolvable:$true] %s476_s26 }
  0x2d   :  { %574 = vmatpush3.bf16.xpose.msra.mxu1 %v563_v9  ;;  %568 = vmatprep.subr.bf16.mxu0 %v567_v11  ;;  %v409_v41 = vsub.s32 %v408_v39, %v55_v38  ;;  %vm414_vm4 = vcmp.gt.s32.totalorder %v408_v39, %v55_v38  ;;  %v602_v60 = vpack.i.bf16 %v506_v58, %v505_v57  ;;  %s661_s29 = scalar_lea.vmem %s477_s26, 16  ;;  %s665_s30 = scalar_lea.vmem %s477_s26, 32 }
  0x2e   :  { %576 = vmatprep.subr.bf16.mxu1 %v567_v11  ;;  %v415_v52 = vsel %vm414_vm4, %v408_v39, %v55_v38  ;;  %p662_p2 = scmp.ne.s32.totalorder %s477_s26, %s661_s29  ;;  %p666_p3 = scmp.lt.s32.totalorder %s477_s26, %s477_s26 }
  0x2f   :  { %77 = vadd.xlane.f32.xlu0 %v76_v5  ;;  %v411_v46 = vsub.s32 0, %v409_v41  ;;  %vm416_vm7 = vcmp.lt.s32.totalorder %v415_v52, %v503_v51  ;;  %vm417_vm8 = vcmp.lt.s32.totalorder %v415_v52, %v504_v53  ;;  %p667_p4 = scmp.lt.s32.totalorder %s665_s30, %s661_s29 }
  0x30   :  { %570 = vmatpush3.bf16.msra.mxu0 %v567_v11 }
  0x31   :  { %v516_v50 = vmin.u32 %v411_v46, %v409_v41  ;;  %579 = vmatprep.subr.bf16.mxu0 %v741_v61  ;;  %p668_p5 = por %p667_p4, %p666_p3 }
  0x33   :  { %vm413_vm6 = vcmp.eq.s32.totalorder %v516_v50, 1  ;;  %p669_p6 = pnand %p668_p5, %p662_p2 }
  0x34   :  { %vm418_vm9 = vmand %vm413_vm6, %vm416_vm7 }
  0x35   :  { %578 = vmatpush3.bf16.xpose.msra.mxu1 %v567_v11  ;;  %vm419_vm10 = vmand %vm413_vm6, %vm417_vm8  ;;  %v517_v55 = vsel %vm418_vm9, 1.0, %v740_v54  ;;  %v742_v11 = vmov 1.0  }
  0x36   :  { %v518_v56 = vsel %vm419_vm10, 1.0, %v740_v54 }
  0x37   :  { %v608_v59 = vpack.i.bf16 %v518_v56, %v517_v55 }
  0xb8   :  { %v75_v12 = vpop.xlane.xlu0 %74 }
  0xb9   :  { %v79_v13 = vmax.f32 %v75_v12, 1e-24 }
  0xbb   :  { %613 = vrsqrt.f32 %v79_v13 }
  0xbc   :  { %v78_v14 = vpop.xlane.xlu0 %77 }
  0xbd   :  { %v80_v15 = vmax.f32 %v78_v14, 1e-24 }
  0xbf   :  { %615 = vrsqrt.f32 %v80_v15 }
  0xc5   :  { %v614_v16 = vpop.eup %613 }
  0xc6   :  { %v815_v17 = vmul.f32 %v614_v16, %v50_v0 }
  0xc8   :  { %542 = vmatprep.mubr.msk.f32.mxu0 %vm72_vm0, %v815_v17  ;;  %v406_v0 = vrot.slane %v815_v17, 1 }
  0xc9   :  { %v616_v18 = vpop.eup %615 }
  0xca   :  { %v819_v19 = vmul.f32 %v616_v18, %v51_v1  ;;  %v424_v7 = vsub.f32 %v815_v17, %v406_v0 }
  0xcc   :  { %543 = vmatmul.mubr.msk.f32.vlgmr.msra.gmra.mrb[0].mxu0 %vm72_vm0, %v819_v19  ;;  %v407_v4 = vrot.slane %v819_v19, 1  ;;  %v426_v13 = vmul.f32 %v424_v7, %v424_v7 }
  0xce   :  { %v425_v10 = vsub.f32 %v819_v19, %v407_v4 }
  0xd0   :  { %v427_v15 = vmul.f32 %v425_v10, %v425_v10 }
 0x19f   :  { %v544_v20 = vpop.f32.mrb[0].mxu0 }
 0x1a0   :  { %v161_v21 = vpop.f32.mrb[1].mxu0  ;;  %v172_v24 = vmul.f32 2.0, %v544_v20 }
 0x1a1   :  { %v171_v23 = vmul.f32 2.0, %v161_v21 }
 0x1a2   :  { %v180_v26 = vsub.f32 %v509_v22, %v172_v24 }
 0x1a3   :  { %v179_v25 = vsub.f32 %v509_v22, %v171_v23  ;;  %v743_v22 = vmov 1.0|1.0  }
 0x1a5   :  { %181 = vmin.xlane.f32.xlu1 %v179_v25 }
 0x1a9   :  { %183 = vmin.xlane.f32.xlu1 %v180_v26 }
 0x232   :  { %v182_v29 = vpop.xlane.xlu1 %181 }
 0x233   :  { %vm187_vm1 = vcmp.le.f32.partialorder %v179_v25, %v182_v29 }
 0x234   :  { %v189_v30 = vsel %vm187_vm1, %v826_v28, 128  ;;  %vm744_vm1 = vmmov 0  }
 0x235   :  { %v192_v31 = vshra.s32 %v189_v30, 16  ;;  %v191_v40 = vand.u32 65535, %v189_v30  ;;  %560 = vmatprep.mubr.msk.f32.mxu0 %vm744_vm1, %v740_v54 }
 0x236   :  { %v184_v32 = vpop.xlane.xlu1 %183 }
 0x237   :  { %vm188_vm2 = vcmp.le.f32.partialorder %v180_v26, %v184_v32  ;;  %v194_v33 = vcvt.s32.f32 %v192_v31  ;;  %v193_v44 = vcvt.s32.f32 %v191_v40  ;;  %v314_v26 = vcvt.s32.f32 %v826_v28 }
 0x238   :  { %v190_v34 = vsel %vm188_vm2, %v826_v28, 128  ;;  %vm386_vm2 = vcmask 122880  }
 0x239   :  { %195 = vmin.xlane.f32.xlu0 %v194_v33  ;;  %v206_v35 = vshra.s32 %v190_v34, 16  ;;  %v205_v42 = vand.u32 65535, %v190_v34 }
 0x23b   :  { %v208_v36 = vcvt.s32.f32 %v206_v35  ;;  %v207_v48 = vcvt.s32.f32 %v205_v42 }
 0x23d   :  { %209 = vmin.xlane.f32.xlu1 %v208_v36 }
 0x2c6   :  { %v196_v43 = vpop.xlane.xlu0 %195 }
 0x2c7   :  { %vm197_vm3 = vcmp.eq.f32.partialorder %v194_v33, %v196_v43  ;;  %v202_v62 = vcvt.f32.s32 %v196_v43 }
 0x2c8   :  { %v198_v45 = vsel %vm197_vm3, %v193_v44, inf }
 0x2c9   :  { %199 = vmin.xlane.f32.xlu0 %v198_v45  ;;  %v203_v1 = vshll.u32 %v202_v62, 16 }
 0x2ca   :  { %v210_v47 = vpop.xlane.xlu1 %209 }
 0x2cb   :  { %vm211_vm5 = vcmp.eq.f32.partialorder %v208_v36, %v210_v47  ;;  %v216_v2 = vcvt.f32.s32 %v210_v47 }
 0x2cc   :  { %v212_v49 = vsel %vm211_vm5, %v207_v48, inf }
 0x2cd   :  { %213 = vmin.xlane.f32.xlu1 %v212_v49  ;;  %v217_v8 = vshll.u32 %v216_v2, 16 }
 0x2de   :  { %609 = vperm.xlu1 %607, %v608_v59  }
 0x2df   :  { %603 = vperm.xlu0 %601, %v602_v60  }
 0x356   :  { %v200_v63 = vpop.xlane.xlu0 %199 }
 0x357   :  { %v201_v3 = vcvt.f32.s32 %v200_v63 }
 0x359   :  { %v204_v5 = vadd.s32 %v203_v1, %v201_v3 }
 0x35a   :  { %v214_v6 = vpop.xlane.xlu1 %213 }
 0x35b   :  { %v215_v9 = vcvt.f32.s32 %v214_v6  ;;  %vm219_vm13 = vcmp.eq.s32.totalorder %v826_v28, %v204_v5 }
 0x35c   :  { %553 = vmatprep.mubr.msk.f32.mxu1 %vm219_vm13, %v742_v11 }
 0x35d   :  { %v218_v12 = vadd.s32 %v217_v8, %v215_v9 }
 0x35e   :  { %v610_v14 = vpop.permute.xlu1 %609  ;;  %v604_v27 = vpop.permute.xlu0 %603 }
 0x35f   :  { %vm220_vm14 = vcmp.eq.s32.totalorder %v826_v28, %v218_v12  ;;  %v612_v16 = vunpack.i.h.bf16 %v610_v14  ;;  %v611_v18 = vunpack.i.l.bf16 %v610_v14  ;;  %v606_v29 = vunpack.i.h.bf16 %v604_v27 }
 0x360   :  { %vm580_vm15 = vmpackc.low %vm220_vm14, %vm219_vm13  ;;  %554 = vmatmul.mubr.msk.f32.vlgmr.msra.gmra.mrb[0].mxu1 %vm220_vm14, %v742_v11  ;;  %v605_v30 = vunpack.i.l.bf16 %v604_v27 }
 0x361   :  { %v439_v20 = vmul.f32 %v612_v16, %v427_v15  ;;  %v438_v21 = vmul.f32 %v611_v18, %v426_v13  ;;  %581 = vmatpush3.bf16.xpose.msk.msra.mxu0 %vm580_vm15, %v743_v22 }
 0x363   :  { %v440_v23 = vsel %vm72_vm0, %v438_v21, 0.0  ;;  %v441_v24 = vsel %vm72_vm0, %v439_v20, 0.0 }
 0x364   :  { %v442_v25 = vadd.f32 %v441_v24, %v440_v23 }
 0x366   :  { %443 = vadd.xlane.f32.xlu0 %v442_v25 }
 0x368   :  { %561 = vmatmul.mubr.f32.vlgmr.msra.gmra.mrb[2].mxu0 %v314_v26 }
 0x433   :  { %v555_v31 = vpop.f32.mrb[0].mxu1 }
 0x434   :  { %v311_v32 = vmul.f32 %v606_v29, %v555_v31  ;;  %v291_v33 = vpop.f32.mrb[1].mxu1 }
 0x435   :  { %v310_v34 = vmul.f32 %v605_v30, %v291_v33 }
 0x436   :  { %v389_v35 = vsub.f32 %v819_v19, %v311_v32  ;;  %313 = vst.msk [vmem:[#allocation7 + $0x8] sm:$0xff] %vm72_vm0, %v311_v32 }
 0x437   :  { %v388_v36 = vsub.f32 %v815_v17, %v310_v34  ;;  %312 = vst.msk [vmem:[#allocation7] sm:$0xff] %vm72_vm0, %v310_v34 }
 0x438   :  { %v391_v37 = vmul.f32 %v389_v35, %v389_v35 }
 0x439   :  { %v390_v38 = vmul.f32 %v388_v36, %v388_v36 }
 0x43a   :  { %v393_v39 = vmul.f32 %v606_v29, %v391_v37 }
 0x43b   :  { %v392_v40 = vmul.f32 %v605_v30, %v390_v38  ;;  %v381_v44 = vpop.f32.mrb[2].mxu0 }
 0x43c   :  { %v395_v41 = vsel %vm72_vm0, %v393_v39, 0.0  ;;  %v582_v45 = vtrunc.f32 %v381_v44  ;;  %v562_v46 = vpop.f32.mrb[3].mxu0 }
 0x43d   :  { %v394_v42 = vsel %vm72_vm0, %v392_v40, 0.0 }
 0x43e   :  { %v396_v43 = vadd.f32 %v395_v41, %v394_v42  ;;  %v583_v19 = vcvt.f32.s32 %v582_v45 }
 0x440   :  { %397 = vadd.xlane.f32.xlu1 %v396_v43  ;;  %387 = vst.msk [vmem:[#allocation8] sm:$0x1] %vm386_vm2, %v583_v19 }
 0x441   :  { %672 = shalt.err (!%p669_p6)
}
 0x442   :  { %s673_s11 = scalar_lea.hbm %s896_s5, 16 }
 0x443   :  { %p674_p7 = scmp.ne.s32.totalorder %s896_s5, %s673_s11  ;;  %p677_p8 = scmp.lt.u32.totalorder %s673_s11, %s896_s5 }
 0x445   :  { %p679_p9 = pnand %p677_p8, %p674_p7 }
 0x447   :  { %682 = shalt.err (!%p679_p9)
}
 0x448   :  { %479 = dma.vmem_to_hbm [thread:$0]  %s477_s26, 16, %s896_s5, [#allocation9]  }
 0x449   :  { %s683_s18 = scalar_lea.vmem %s464_s28, 256  ;;  %p688_p11 = scmp.lt.s32.totalorder %s464_s28, %s464_s28 }
 0x44a   :  { %p684_p10 = scmp.ne.s32.totalorder %s464_s28, %s683_s18  ;;  %p689_p12 = scmp.lt.s32.totalorder %s683_s18, %s683_s18 }
 0x44c   :  { %p690_p13 = por %p689_p12, %p688_p11 }
 0x44e   :  { %p691_p0 = pnand %p690_p13, %p684_p10 }
 0x450   :  { %694 = shalt.err (!%p691_p0)
}
 0x451   :  { %s695_s0 = scalar_lea.hbm %s895_s4, 256 }
 0x452   :  { %p696_p1 = scmp.ne.s32.totalorder %s895_s4, %s695_s0  ;;  %p699_p2 = scmp.lt.u32.totalorder %s695_s0, %s895_s4 }
 0x454   :  { %p701_p3 = pnand %p699_p2, %p696_p1 }
 0x456   :  { %704 = shalt.err (!%p701_p3)
}
 0x457   :  { %469 = dma.vmem_to_hbm [thread:$0]  %s464_s28, 256, %s895_s4, [#allocation4], %s736_s7, %s736_s7, %s737_s8   ;;  %v444_v17 = vpop.xlane.xlu0 %443  ;;  %vm452_vm0 = vcmp.eq.s32.totalorder %v826_v28, 0  ;;  %vm456_vm3 = vcmask 8192  }
 0x458   :  { %v445_v47 = vrot.slane %v444_v17, 4  ;;  %s747_s24 = smov [#allocation10]  }
 0x459   :  { %s486_s25 = sshll.u32 %s747_s24, 4  ;;  %s487_s25 = int_to_ptr.vmem [resolvable:$true] %s486_s25 }
 0x45a   :  { %v446_v48 = vadd.f32 %v445_v47, %v444_v17  ;;  %s705_s7 = scalar_lea.vmem %s487_s25, 16  ;;  %s709_s8 = scalar_lea.vmem %s487_s25, 32 }
 0x45b   :  { %p706_p4 = scmp.ne.s32.totalorder %s487_s25, %s705_s7  ;;  %p710_p5 = scmp.lt.s32.totalorder %s487_s25, %s487_s25 }
 0x45c   :  { %v447_v49 = vrot.slane %v446_v48, 2  ;;  %p711_p6 = scmp.lt.s32.totalorder %s709_s8, %s705_s7 }
 0x45e   :  { %v448_v53 = vadd.f32 %v447_v49, %v446_v48  ;;  %p712_p7 = por %p711_p6, %p710_p5 }
 0x460   :  { %v449_v56 = vrot.slane %v448_v53, 1  ;;  %p713_p8 = pnand %p712_p7, %p706_p4 }
 0x462   :  { %v450_v59 = vadd.f32 %v449_v56, %v448_v53 }
 0x4cd   :  { %v398_v50 = vpop.xlane.xlu1 %397 }
 0x4ce   :  { %v399_v51 = vrot.slane %v398_v50, 4 }
 0x4d0   :  { %v400_v52 = vadd.f32 %v399_v51, %v398_v50 }
 0x4d2   :  { %v401_v54 = vrot.slane %v400_v52, 2 }
 0x4d4   :  { %v402_v55 = vadd.f32 %v401_v54, %v400_v52 }
 0x4d6   :  { %v403_v57 = vrot.slane %v402_v55, 1 }
 0x4d8   :  { %v404_v58 = vadd.f32 %v403_v57, %v402_v55 }
 0x4da   :  { %584 = vpush %v404_v58 }
 0x4db   :  { %586 = vpush %v450_v59 }
 0x50b   :  { %s585_s1 = spop %584 }
 0x50c   :  { %v453_v60 = vstv %s585_s1  ;;  %s587_s4 = spop %586 }
 0x50d   :  { %v454_v61 = vstv %s587_s4 }
 0x50e   :  { %v455_v62 = vsel %vm452_vm0, %v453_v60, %v454_v61 }
 0x50f   :  { %457 = vst.msk [vmem:[#allocation10] sm:$0x1] %vm456_vm3, %v455_v62 }
 0x510   :  { %716 = shalt.err (!%p713_p8)
}
 0x511   :  { %s717_s28 = scalar_lea.hbm %s897_s6, 16 }
 0x512   :  { %p718_p9 = scmp.ne.s32.totalorder %s897_s6, %s717_s28  ;;  %p721_p10 = scmp.lt.u32.totalorder %s717_s28, %s897_s6 }
 0x514   :  { %p723_p11 = pnand %p721_p10, %p718_p9 }
 0x516   :  { %726 = shalt.err (!%p723_p11)
}
 0x517   :  { %489 = dma.vmem_to_hbm [thread:$0]  %s487_s25, 16, %s897_s6, [#allocation9]  }
 0x518   :  { %731 = dma.done.wait [#allocation4], 256  }
 0x519   :  { %732 = vsyncadd [#allocation4], 4294967040 }
 0x51a   :  { %733 = dma.done.wait [#allocation9], 32  }
 0x51b   :  { %734 = vsyncadd [#allocation9], 4294967264 }
 0x51c   :  { %499 = vsyncpa [#allocation3], 1 }
 0x51d   :  { %500 = vsyncpa [#allocation6], 1 }
 0x51e   :  { %501 = vsyncpa [#allocation4], 1 }
 0x51f   :  { %502 = vsyncpa [#allocation9], 1 }

</bundles_post_ra>
